<compile_context>
chip_gen: v6e
topology: v6e:2x2x1
jax: 0.10.0
libtpu: 0.0.40
codegen_flags: <defaults>
</compile_context>

<pallas_src>
import functools

import jax
import jax.numpy as jnp
from jax import lax
from jax.experimental import pallas as pl
from jax.experimental.pallas import tpu as pltpu


def _round_up(x: int, m: int) -> int:
    return ((x + m - 1) // m) * m


def _vmem_limit_bytes() -> int:
    """Scoped-VMEM limit we request: half of physical, capped at 64 MiB.

    v5e/v6e (128 MiB physical) -> 64 MiB; v7x (64 MiB physical) -> 32 MiB.
    Falls back to a conservative 32 MiB if the query is unavailable.
    """
    try:
        cap = int(pltpu.get_tpu_info().vmem_capacity_bytes)
    except Exception:
        cap = 64 * 1024 * 1024
    return int(min(cap // 2, 64 * 1024 * 1024))


def _pick_block_rows(n: int, c: int, itemsize: int, max_tile_bytes: int) -> int:
    """Row tile: multiple of 8, sized by bytes (lane-padded C, real itemsize)."""
    c_lane = _round_up(c, 128)
    tm = max_tile_bytes // max(1, c_lane * itemsize)
    tm = (tm // 8) * 8
    return max(8, min(tm, 8192, _round_up(n, 8)))


# --------------------------------------------------------------------------
# Kernels
# --------------------------------------------------------------------------

def _bn_fused_kernel(g_ref, b_ref, x_ref, y_ref, mean_ref, var_ref, *,
                     n_rows: int, eps: float):
    """Whole-x-in-VMEM path: exact centered mean/var + normalize in one pass."""
    x = x_ref[...].astype(jnp.float32)                      # (N, C)
    inv_n = jnp.float32(1.0 / n_rows)
    mean = jnp.sum(x, axis=0, keepdims=True) * inv_n        # (1, C)
    d = x - mean
    var = jnp.sum(d * d, axis=0, keepdims=True) * inv_n     # (1, C), >= 0 exactly
    inv_std = lax.rsqrt(var + jnp.float32(eps))
    scale = g_ref[...].astype(jnp.float32) * inv_std
    y_ref[...] = (d * scale + b_ref[...].astype(jnp.float32)).astype(y_ref.dtype)
    mean_ref[...] = mean
    var_ref[...] = var


def _bn_stats_kernel(c_ref, x_ref, sum_ref, sq_ref, *,
                     tm: int, n_rows: int, tiles: int, need_mask: bool):
    """Streaming per-shard reduction: sum / sum-of-squares of (x - x[0])."""
    s = pl.program_id(0)
    i = pl.program_id(1)
    steps = pl.num_programs(1)

    @pl.when(i == 0)
    def _():
        sum_ref[...] = jnp.zeros_like(sum_ref)
        sq_ref[...] = jnp.zeros_like(sq_ref)

    x = x_ref[...].astype(jnp.float32)                      # (tm, C)
    xc = x - c_ref[...]                                     # shift by x[0] (stability)

    if need_mask:
        tile = s * steps + i                                # logical tile (may overhang)
        row0 = jnp.minimum(tile, tiles - 1) * tm            # matches clamped index_map
        rows = row0 + lax.broadcasted_iota(jnp.int32, (tm, 1), 0)
        valid = (rows < n_rows) & (tile < tiles)
        xc = jnp.where(valid, xc, 0.0)

    sum_ref[...] += jnp.sum(xc, axis=0, keepdims=True)[None]        # (1,1,C)
    sq_ref[...] += jnp.sum(xc * xc, axis=0, keepdims=True)[None]    # (1,1,C)


def _bn_apply_kernel(ss_ref, x_ref, o_ref):
    """y = x * scale + shift for one independent row tile."""
    x = x_ref[...].astype(jnp.float32)
    o_ref[...] = (x * ss_ref[0:1, :] + ss_ref[1:2, :]).astype(o_ref.dtype)


# --------------------------------------------------------------------------
# Wrapper
# --------------------------------------------------------------------------

def _apply_pass(x, scale_shift, tm, vmem_limit):
    n, c = x.shape
    itemsize = jnp.dtype(x.dtype).itemsize
    tiles = pl.cdiv(n, tm)
    return pl.pallas_call(
        _bn_apply_kernel,
        out_shape=jax.ShapeDtypeStruct((n, c), x.dtype),
        grid_spec=pltpu.PrefetchScalarGridSpec(
            num_scalar_prefetch=0,
            grid=(tiles,),
            in_specs=[pl.BlockSpec((2, c), lambda i: (0, 0)),
                      pl.BlockSpec((tm, c), lambda i: (i, 0))],
            out_specs=pl.BlockSpec((tm, c), lambda i: (i, 0)),
        ),
        compiler_params=pltpu.CompilerParams(
            dimension_semantics=("parallel",),
            vmem_limit_bytes=vmem_limit),
        cost_estimate=pl.CostEstimate(
            flops=2 * n * c, transcendentals=0,
            bytes_accessed=2 * n * c * itemsize),
    )(scale_shift, x)


def batchnorm1d_forward(x, gamma, beta, running_mean, running_var, *,
                        eps: float = 1e-5, momentum: float = 0.9,
                        training: bool = True,
                        block_rows: int | None = None,
                        use_fused: bool | None = None):
    """BatchNorm1d forward. Returns (y, new_running_mean, new_running_var)."""
    n, c = x.shape
    itemsize = jnp.dtype(x.dtype).itemsize
    vmem_limit = _vmem_limit_bytes()
    max_tile_bytes = vmem_limit // 8          # apply kernel double-buffers in+out

    if block_rows is None:
        tm = _pick_block_rows(n, c, itemsize, max_tile_bytes)
    else:
        tm = min(max(8, _round_up(block_rows, 8)), _round_up(n, 8))

    gamma_f = gamma.astype(jnp.float32)
    beta_f = beta.astype(jnp.float32)

    if training:
        fits_vmem = _round_up(n, 8) * _round_up(c, 128) * 4 <= max_tile_bytes
        fused = fits_vmem if use_fused is None else use_fused

        if fused:
            # Single-pass kernel: read x once, write y once.
            y, mean_p, var_p = pl.pallas_call(
                functools.partial(_bn_fused_kernel, n_rows=n, eps=eps),
                out_shape=[jax.ShapeDtypeStruct((n, c), x.dtype),
                           jax.ShapeDtypeStruct((1, c), jnp.float32),
                           jax.ShapeDtypeStruct((1, c), jnp.float32)],
                grid_spec=pltpu.PrefetchScalarGridSpec(
                    num_scalar_prefetch=0,
                    grid=(1,),
                    in_specs=[pl.BlockSpec((1, c), lambda i: (0, 0)),
                              pl.BlockSpec((1, c), lambda i: (0, 0)),
                              pl.BlockSpec((n, c), lambda i: (0, 0))],
                    out_specs=[pl.BlockSpec((n, c), lambda i: (0, 0)),
                               pl.BlockSpec((1, c), lambda i: (0, 0)),
                               pl.BlockSpec((1, c), lambda i: (0, 0))],
                ),
                compiler_params=pltpu.CompilerParams(
                    dimension_semantics=("arbitrary",),
                    vmem_limit_bytes=vmem_limit),
                cost_estimate=pl.CostEstimate(
                    flops=6 * n * c, transcendentals=c,
                    bytes_accessed=2 * n * c * itemsize),
            )(gamma_f.reshape(1, c), beta_f.reshape(1, c), x)
            batch_mean = mean_p[0]
            batch_var = var_p[0]
        else:
            # Streaming stats pass (2-way sharded for megacore) + apply pass.
            tiles = pl.cdiv(n, tm)
            shards = 2 if tiles >= 2 else 1
            steps = pl.cdiv(tiles, shards)
            need_mask = (tiles * tm != n) or (shards * steps != tiles)
            shift_row = x[0:1, :].astype(jnp.float32)        # (1, C) stability shift

            x_map = lambda s, i: (jnp.minimum(s * steps + i, tiles - 1), 0)
            sums, sqs = pl.pallas_call(
                functools.partial(_bn_stats_kernel, tm=tm, n_rows=n,
                                  tiles=tiles, need_mask=need_mask),
                out_shape=[jax.ShapeDtypeStruct((shards, 1, c), jnp.float32),
                           jax.ShapeDtypeStruct((shards, 1, c), jnp.float32)],
                grid_spec=pltpu.PrefetchScalarGridSpec(
                    num_scalar_prefetch=0,
                    grid=(shards, steps),
                    in_specs=[pl.BlockSpec((1, c), lambda s, i: (0, 0)),
                              pl.BlockSpec((tm, c), x_map)],
                    out_specs=[pl.BlockSpec((1, 1, c), lambda s, i: (s, 0, 0)),
                               pl.BlockSpec((1, 1, c), lambda s, i: (s, 0, 0))],
                ),
                compiler_params=pltpu.CompilerParams(
                    dimension_semantics=("parallel", "arbitrary"),
                    vmem_limit_bytes=vmem_limit),
                cost_estimate=pl.CostEstimate(
                    flops=4 * n * c, transcendentals=0,
                    bytes_accessed=n * c * itemsize),
            )(shift_row, x)

            # Tiny (C,)-sized combine / finalize in plain JAX.
            inv_n = 1.0 / n
            s1 = jnp.sum(sums, axis=(0, 1)) * inv_n          # E[x - c0]
            s2 = jnp.sum(sqs, axis=(0, 1)) * inv_n           # E[(x - c0)^2]
            batch_mean = s1 + shift_row[0]
            batch_var = jnp.maximum(s2 - s1 * s1, 0.0)

            inv_std = lax.rsqrt(batch_var + jnp.float32(eps))
            scale = gamma_f * inv_std
            shift = beta_f - batch_mean * scale
            y = _apply_pass(x, jnp.stack([scale, shift], axis=0), tm, vmem_limit)

        new_running_mean = (momentum * running_mean.astype(jnp.float32)
                            + (1.0 - momentum) * batch_mean).astype(running_mean.dtype)
        new_running_var = (momentum * running_var.astype(jnp.float32)
                           + (1.0 - momentum) * batch_var).astype(running_var.dtype)
        return y, new_running_mean, new_running_var

    # eval: use running stats; scale/shift finalize is (C,)-sized -> plain JAX.
    inv_std = lax.rsqrt(running_var.astype(jnp.float32) + jnp.float32(eps))
    scale = gamma_f * inv_std
    shift = beta_f - running_mean.astype(jnp.float32) * scale
    y = _apply_pass(x, jnp.stack([scale, shift], axis=0), tm, vmem_limit)
    return y, running_mean, running_var


# --------------------------------------------------------------------------
# Demo / self-test
# --------------------------------------------------------------------------

if __name__ == "__main__":
    key = jax.random.PRNGKey(0)
    kx, kg, kb, kx2 = jax.random.split(key, 4)

    eps = 1e-5
    momentum = 0.9

    N, C = 32, 32   # batch=32, num_features (hidden)=32
    x = jax.random.normal(kx, (N, C), dtype=jnp.float32) * 2.0 + 0.5
    gamma = 1.0 + 0.1 * jax.random.normal(kg, (C,), dtype=jnp.float32)
    beta = 0.1 * jax.random.normal(kb, (C,), dtype=jnp.float32)
    rm0 = jnp.zeros((C,), jnp.float32)
    rv0 = jnp.ones((C,), jnp.float32)

    def ref_train(xv, rm, rv):
        m = jnp.mean(xv, axis=0)
        v = jnp.mean((xv - m) ** 2, axis=0)
        y = gamma * (xv - m) / jnp.sqrt(v + eps) + beta
        return (y,
                momentum * rm + (1.0 - momentum) * m,
                momentum * rv + (1.0 - momentum) * v)

    # 1) Fused single-call path (auto-selected: x fits in VMEM).
    y, rm, rv = batchnorm1d_forward(x, gamma, beta, rm0, rv0,
                                    eps=eps, momentum=momentum, training=True)
    jax.block_until_ready(y)
    y_r, rm_r, rv_r = ref_train(x, rm0, rv0)
    assert jnp.allclose(y, y_r, rtol=1e-4, atol=1e-5)
    assert jnp.allclose(rm, rm_r, rtol=1e-5, atol=1e-6)
    assert jnp.allclose(rv, rv_r, rtol=1e-4, atol=1e-5)

    # 2) Streaming path (sharded stats, masked ragged last tile), ragged N.
    N2 = 37
    x2 = jax.random.normal(kx2, (N2, C), dtype=jnp.float32) * 3.0 - 1.0
    y2, rm2, rv2 = batchnorm1d_forward(x2, gamma, beta, rm0, rv0,
                                       eps=eps, momentum=momentum, training=True,
                                       use_fused=False, block_rows=8)
    jax.block_until_ready(y2)
    y2_r, rm2_r, rv2_r = ref_train(x2, rm0, rv0)
    assert jnp.allclose(y2, y2_r, rtol=1e-4, atol=1e-5)
    assert jnp.allclose(rm2, rm2_r, rtol=1e-5, atol=1e-6)
    assert jnp.allclose(rv2, rv2_r, rtol=1e-4, atol=1e-5)

    # 3) Eval path (uses running stats, apply kernel only).
    y_e, _, _ = batchnorm1d_forward(x, gamma, beta, rm, rv,
                                    eps=eps, momentum=momentum, training=False)
    jax.block_until_ready(y_e)
    y_e_r = gamma * (x - rm_r) / jnp.sqrt(rv_r + eps) + beta
    assert jnp.allclose(y_e, y_e_r, rtol=1e-4, atol=1e-5)

    print("KERNEL_OK")
</pallas_src>

<mosaic_0001>
module attributes {stable_mosaic.version = 11 : i64} {
  func.func @_bn_fused_kernel(%arg0: i32, %arg1: memref<1x32xf32, #tpu.memory_space<vmem>>, %arg2: memref<1x32xf32, #tpu.memory_space<vmem>>, %arg3: memref<32x32xf32, #tpu.memory_space<vmem>>, %arg4: memref<32x32xf32, #tpu.memory_space<vmem>>, %arg5: memref<1x32xf32, #tpu.memory_space<vmem>>, %arg6: memref<1x32xf32, #tpu.memory_space<vmem>>) attributes {dimension_semantics = [#tpu.dimension_semantics<arbitrary>], iteration_bounds = array<i64: 1>, scalar_prefetch = 0 : i64, scratch_operands = 0 : i64, tpu.core_type = #tpu.core_type<tc>, window_params = [{pipeline_mode = #tpu.pipeline_mode<synchronous>, transform_indices = @transform_0, window_bounds = array<i64: 1, 32>}, {pipeline_mode = #tpu.pipeline_mode<synchronous>, transform_indices = @transform_1, window_bounds = array<i64: 1, 32>}, {pipeline_mode = #tpu.pipeline_mode<synchronous>, transform_indices = @transform_2, window_bounds = array<i64: 32, 32>}, {pipeline_mode = #tpu.pipeline_mode<synchronous>, transform_indices = @transform_3, window_bounds = array<i64: 32, 32>}, {pipeline_mode = #tpu.pipeline_mode<synchronous>, transform_indices = @transform_4, window_bounds = array<i64: 1, 32>}, {pipeline_mode = #tpu.pipeline_mode<synchronous>, transform_indices = @transform_5, window_bounds = array<i64: 1, 32>}]} {
    %c0 = arith.constant 0 : index
    %c0_0 = arith.constant 0 : index
    %0 = vector.load %arg3[%c0, %c0_0] : memref<32x32xf32, #tpu.memory_space<vmem>>, vector<32x32xf32>
    %cst = arith.constant dense<0.000000e+00> : vector<32xf32>
    %1 = vector.multi_reduction <add>, %0, %cst [0] : vector<32x32xf32> to vector<32xf32>
    %2 = vector.shape_cast %1 : vector<32xf32> to vector<1x32xf32>
    %cst_1 = arith.constant 3.125000e-02 : f32
    %3 = vector.broadcast %cst_1 : f32 to vector<1x32xf32>
    %4 = arith.mulf %2, %3 : vector<1x32xf32>
    %5 = vector.broadcast %4 : vector<1x32xf32> to vector<32x32xf32>
    %6 = arith.subf %0, %5 : vector<32x32xf32>
    %7 = arith.mulf %6, %6 : vector<32x32xf32>
    %cst_2 = arith.constant dense<0.000000e+00> : vector<32xf32>
    %8 = vector.multi_reduction <add>, %7, %cst_2 [0] : vector<32x32xf32> to vector<32xf32>
    %9 = vector.shape_cast %8 : vector<32xf32> to vector<1x32xf32>
    %cst_3 = arith.constant 3.125000e-02 : f32
    %10 = vector.broadcast %cst_3 : f32 to vector<1x32xf32>
    %11 = arith.mulf %9, %10 : vector<1x32xf32>
    %cst_4 = arith.constant 9.99999974E-6 : f32
    %12 = vector.broadcast %cst_4 : f32 to vector<1x32xf32>
    %13 = arith.addf %11, %12 : vector<1x32xf32>
    %14 = math.rsqrt %13 : vector<1x32xf32>
    %c0_5 = arith.constant 0 : index
    %c0_6 = arith.constant 0 : index
    %15 = vector.load %arg1[%c0_5, %c0_6] : memref<1x32xf32, #tpu.memory_space<vmem>>, vector<1x32xf32>
    %16 = arith.mulf %15, %14 : vector<1x32xf32>
    %17 = vector.broadcast %16 : vector<1x32xf32> to vector<32x32xf32>
    %18 = arith.mulf %6, %17 : vector<32x32xf32>
    %c0_7 = arith.constant 0 : index
    %c0_8 = arith.constant 0 : index
    %19 = vector.load %arg2[%c0_7, %c0_8] : memref<1x32xf32, #tpu.memory_space<vmem>>, vector<1x32xf32>
    %20 = vector.broadcast %19 : vector<1x32xf32> to vector<32x32xf32>
    %21 = arith.addf %18, %20 : vector<32x32xf32>
    %c0_9 = arith.constant 0 : index
    %c0_10 = arith.constant 0 : index
    %22 = vector.load %arg4[%c0_9, %c0_10] : memref<32x32xf32, #tpu.memory_space<vmem>>, vector<32x32xf32>
    tpu.vector_store %arg4[%c0_9, %c0_10], %21 {strides = array<i32>} : memref<32x32xf32, #tpu.memory_space<vmem>>, vector<32x32xf32>,
    %c0_11 = arith.constant 0 : index
    %c0_12 = arith.constant 0 : index
    %23 = vector.load %arg5[%c0_11, %c0_12] : memref<1x32xf32, #tpu.memory_space<vmem>>, vector<1x32xf32>
    tpu.vector_store %arg5[%c0_11, %c0_12], %4 {strides = array<i32>} : memref<1x32xf32, #tpu.memory_space<vmem>>, vector<1x32xf32>,
    %c0_13 = arith.constant 0 : index
    %c0_14 = arith.constant 0 : index
    %24 = vector.load %arg6[%c0_13, %c0_14] : memref<1x32xf32, #tpu.memory_space<vmem>>, vector<1x32xf32>
    tpu.vector_store %arg6[%c0_13, %c0_14], %11 {strides = array<i32>} : memref<1x32xf32, #tpu.memory_space<vmem>>, vector<1x32xf32>,
    return
  }
  func.func @transform_0(%arg0: i32) -> (i32, i32) {
    %c0_i32 = arith.constant 0 : i32
    %c0_i32_0 = arith.constant 0 : i32
    %c0_i32_1 = arith.constant 0 : i32
    return %c0_i32, %c0_i32_0 : i32, i32
  }
  func.func @transform_1(%arg0: i32) -> (i32, i32) {
    %c0_i32 = arith.constant 0 : i32
    %c0_i32_0 = arith.constant 0 : i32
    %c0_i32_1 = arith.constant 0 : i32
    return %c0_i32, %c0_i32_0 : i32, i32
  }
  func.func @transform_2(%arg0: i32) -> (i32, i32) {
    %c0_i32 = arith.constant 0 : i32
    %c0_i32_0 = arith.constant 0 : i32
    %c0_i32_1 = arith.constant 0 : i32
    return %c0_i32, %c0_i32_0 : i32, i32
  }
  func.func @transform_3(%arg0: i32) -> (i32, i32) {
    %c0_i32 = arith.constant 0 : i32
    %c0_i32_0 = arith.constant 0 : i32
    %c0_i32_1 = arith.constant 0 : i32
    return %c0_i32, %c0_i32_0 : i32, i32
  }
  func.func @transform_4(%arg0: i32) -> (i32, i32) {
    %c0_i32 = arith.constant 0 : i32
    %c0_i32_0 = arith.constant 0 : i32
    %c0_i32_1 = arith.constant 0 : i32
    return %c0_i32, %c0_i32_0 : i32, i32
  }
  func.func @transform_5(%arg0: i32) -> (i32, i32) {
    %c0_i32 = arith.constant 0 : i32
    %c0_i32_0 = arith.constant 0 : i32
    %c0_i32_1 = arith.constant 0 : i32
    return %c0_i32, %c0_i32_0 : i32, i32
  }
}

</mosaic_0001>

<bundles_post_ra>
// kernel: tpu_custom_call.1
= control target key start
LH: loop header
LB: loop body
LE: loop exit
PB: predicated region body
PF: predicated region fallthrough
CT: control target
= control target key end

     0   :  { %11 = vsyncpa [#allocation3], 0  ;;  %s356_s0 = inlined_call_operand.hbm [shape: f32[1,32], index: 0, kind: input, shape index: {}]   ;;  %s357_s1 = inlined_call_operand.vmem [shape: f32[1,32], index: 1, kind: input, shape index: {}]   ;;  %s358_s2 = inlined_call_operand.hbm [shape: f32[32,32], index: 2, kind: input, shape index: {}]   ;;  %s359_s3 = inlined_call_operand.hbm [shape: f32[32,32], index: 3, kind: output, shape index: {0}]   ;;  %s360_s4 = inlined_call_operand.hbm [shape: f32[1,32], index: 4, kind: output, shape index: {1}]   ;;  %s361_s5 = inlined_call_operand.hbm [shape: f32[1,32], index: 5, kind: output, shape index: {2}]  }
   0x1   :  { %12 = vsyncpa [#allocation6], 0 }
   0x2   :  { %13 = vsyncpa [#allocation4], 0 }
   0x3   :  { %14 = vsyncpa [#allocation9], 0  ;;  %s281_s18 = smov [#allocation2]   ;;  %s282_s20 = smov [#allocation5]  }
   0x4   :  { %s21_s19 = sshll.u32 %s281_s18, 4  ;;  %s32_s21 = sshll.u32 %s282_s20, 4  ;;  %s22_s19 = int_to_ptr.vmem [resolvable:$true] %s21_s19  ;;  %s33_s21 = int_to_ptr.vmem [resolvable:$true] %s32_s21 }
   0x5   :  { %s181_s22 = scalar_lea.vmem %s22_s19, 16  ;;  %s185_s23 = scalar_lea.vmem %s22_s19, 32 }
   0x6   :  { %p182_p0 = scmp.ne.s32.totalorder %s22_s19, %s181_s22  ;;  %p186_p1 = scmp.lt.s32.totalorder %s22_s19, %s22_s19 }
   0x7   :  { %p187_p2 = scmp.lt.s32.totalorder %s185_s23, %s181_s22 }
   0x9   :  { %p188_p3 = por %p187_p2, %p186_p1 }
   0xb   :  { %p189_p4 = pnand %p188_p3, %p182_p0 }
   0xd   :  { %192 = shalt.err (!%p189_p4)
}
   0xe   :  { %24 = dma.hbm_to_vmem [thread:$0]  %s356_s0, 16, %s22_s19, [#allocation3]  }
   0xf   :  { %s201_s26 = scalar_lea.vmem %s33_s21, 512  ;;  %p206_p6 = scmp.lt.s32.totalorder %s33_s21, %s33_s21 }
  0x10   :  { %p202_p5 = scmp.ne.s32.totalorder %s33_s21, %s201_s26  ;;  %p207_p7 = scmp.lt.s32.totalorder %s201_s26, %s201_s26 }
  0x12   :  { %p208_p8 = por %p207_p7, %p206_p6 }
  0x14   :  { %p209_p9 = pnand %p208_p8, %p202_p5 }
  0x16   :  { %212 = shalt.err (!%p209_p9)
}
  0x17   :  { %s283_s27 = smov 128   ;;  %s284_s28 = smov 8  }
  0x18   :  { %38 = dma.hbm_to_vmem [thread:$0]  %s358_s2, 512, %s33_s21, [#allocation6], %s283_s27, %s283_s27, %s284_s28  }
  0x19   :  { %273 = dma.done.wait [#allocation3], 16  }
  0x1a   :  { %274 = vsyncadd [#allocation3], 4294967280 }
  0x1b   :  { %275 = dma.done.wait [#allocation6], 512  }
  0x1c   :  { %276 = vsyncadd [#allocation6], 4294966784  ;;  %vm49_vm0 = vcmask 261120   ;;  %v45_v0 = vld [vmem:[#allocation5] sm:$0xff]  ;;  %v46_v1 = vld [vmem:[#allocation5 + $0x8] sm:$0xff]  ;;  %s285_s0 = smov [#allocation8]  }
  0x1d   :  { %v47_v2 = vld [vmem:[#allocation5 + $0x10] sm:$0xff]  ;;  %v48_v3 = vld [vmem:[#allocation5 + $0x18] sm:$0xff]  ;;  %v50_v4 = vsel %vm49_vm0, %v45_v0, 0.0  ;;  %v51_v5 = vsel %vm49_vm0, %v46_v1, 0.0  ;;  %s136_s2 = sshll.u32 %s285_s0, 4  ;;  %vm115_vm1 = vcmask 253952   ;;  %s137_s2 = int_to_ptr.vmem [resolvable:$true] %s136_s2 }
  0x1e   :  { %v53_v6 = vsel %vm49_vm0, %v47_v2, 0.0  ;;  %v52_v7 = vadd.f32 %v51_v5, %v50_v4  ;;  %v55_v8 = vsel %vm49_vm0, %v48_v3, 0.0  ;;  %s213_s6 = scalar_lea.vmem %s137_s2, 16  ;;  %s217_s7 = scalar_lea.vmem %s137_s2, 32 }
  0x1f   :  { %p214_p10 = scmp.ne.s32.totalorder %s137_s2, %s213_s6  ;;  %p218_p11 = scmp.lt.s32.totalorder %s137_s2, %s137_s2 }
  0x20   :  { %v54_v9 = vadd.f32 %v53_v6, %v52_v7  ;;  %p219_p12 = scmp.lt.s32.totalorder %s217_s7, %s213_s6 }
  0x22   :  { %v56_v10 = vadd.f32 %v55_v8, %v54_v9  ;;  %p220_p13 = por %p219_p12, %p218_p11 }
  0x24   :  { %v57_v11 = vrot.slane %v56_v10, 4  ;;  %p221_p0 = pnand %p220_p13, %p214_p10 }
  0x26   :  { %v58_v12 = vadd.f32 %v57_v11, %v56_v10 }
  0x28   :  { %v59_v13 = vrot.slane %v58_v12, 2 }
  0x2a   :  { %v60_v14 = vadd.f32 %v59_v13, %v58_v12 }
  0x2c   :  { %v61_v15 = vrot.slane %v60_v14, 1 }
  0x2e   :  { %v62_v16 = vadd.f32 %v61_v15, %v60_v14 }
  0x30   :  { %v63_v17 = vmul.f32 0.03125, %v62_v16 }
  0x32   :  { %v67_v18 = vsub.f32 %v48_v3, %v63_v17  ;;  %116 = vst.msk [vmem:[#allocation8] sm:$0x1] %vm115_vm1, %v63_v17  ;;  %v64_v19 = vsub.f32 %v45_v0, %v63_v17  ;;  %v65_v20 = vsub.f32 %v46_v1, %v63_v17  ;;  %v66_v21 = vsub.f32 %v47_v2, %v63_v17 }
  0x33   :  { %224 = shalt.err (!%p221_p0)
}
  0x34   :  { %139 = dma.vmem_to_hbm [thread:$0]  %s137_s2, 16, %s360_s4, [#allocation9]   ;;  %v68_v22 = vmul.f32 %v64_v19, %v64_v19  ;;  %v69_v23 = vmul.f32 %v65_v20, %v65_v20  ;;  %v70_v24 = vmul.f32 %v66_v21, %v66_v21  ;;  %v71_v25 = vmul.f32 %v67_v18, %v67_v18 }
  0x35   :  { %s286_s4 = smov [#allocation10]  }
  0x36   :  { %v72_v26 = vsel %vm49_vm0, %v68_v22, 0.0  ;;  %v73_v27 = vsel %vm49_vm0, %v69_v23, 0.0  ;;  %v75_v28 = vsel %vm49_vm0, %v70_v24, 0.0  ;;  %v77_v30 = vsel %vm49_vm0, %v71_v25, 0.0  ;;  %s146_s10 = sshll.u32 %s286_s4, 4  ;;  %s147_s10 = int_to_ptr.vmem [resolvable:$true] %s146_s10 }
  0x37   :  { %v74_v29 = vadd.f32 %v73_v27, %v72_v26  ;;  %s233_s11 = scalar_lea.vmem %s147_s10, 16  ;;  %s237_s12 = scalar_lea.vmem %s147_s10, 32 }
  0x38   :  { %p234_p1 = scmp.ne.s32.totalorder %s147_s10, %s233_s11  ;;  %p238_p2 = scmp.lt.s32.totalorder %s147_s10, %s147_s10 }
  0x39   :  { %v76_v31 = vadd.f32 %v75_v28, %v74_v29  ;;  %p239_p3 = scmp.lt.s32.totalorder %s237_s12, %s233_s11 }
  0x3b   :  { %v78_v32 = vadd.f32 %v77_v30, %v76_v31  ;;  %p240_p4 = por %p239_p3, %p238_p2 }
  0x3d   :  { %v79_v33 = vrot.slane %v78_v32, 4  ;;  %p241_p5 = pnand %p240_p4, %p234_p1 }
  0x3f   :  { %v80_v34 = vadd.f32 %v79_v33, %v78_v32 }
  0x41   :  { %v81_v35 = vrot.slane %v80_v34, 2 }
  0x43   :  { %v82_v36 = vadd.f32 %v81_v35, %v80_v34 }
  0x45   :  { %v83_v37 = vrot.slane %v82_v36, 1 }
  0x47   :  { %v84_v38 = vadd.f32 %v83_v37, %v82_v36 }
  0x49   :  { %v85_v39 = vmul.f32 0.03125, %v84_v38 }
  0x4b   :  { %v86_v40 = vadd.f32 1e-05, %v85_v39  ;;  %117 = vst.msk [vmem:[#allocation10] sm:$0x1] %vm115_vm1, %v85_v39 }
  0x4c   :  { %244 = shalt.err (!%p241_p5)
}
  0x4d   :  { %149 = dma.vmem_to_hbm [thread:$0]  %s147_s10, 16, %s361_s5, [#allocation9]   ;;  %171 = vrsqrt.f32 %v86_v40  ;;  %v91_v41 = vlaneseq  ;;  %v88_v43 = vld [vmem:[#allocation2] sm:$0x1] }
  0x4e   :  { %v163_v48 = vld [vmem:[%s357_s1] ss:$0 sm:$0xff]  ;;  %s287_s17 = smov [#allocation7]  }
  0x4f   :  { %v92_v42 = vshrl.u32 %v91_v41, 7  ;;  %s123_s18 = sshll.u32 %s287_s17, 4  ;;  %s124_s18 = int_to_ptr.vmem [resolvable:$true] %s123_s18 }
  0x50   :  { %s253_s1 = scalar_lea.vmem %s124_s18, 512  ;;  %p258_p7 = scmp.lt.s32.totalorder %s124_s18, %s124_s18 }
  0x51   :  { %v93_v44 = vsub.s32 0, %v92_v42  ;;  %p254_p6 = scmp.ne.s32.totalorder %s124_s18, %s253_s1  ;;  %p259_p8 = scmp.lt.s32.totalorder %s253_s1, %s253_s1 }
  0x53   :  { %p260_p9 = por %p259_p8, %p258_p7 }
  0x55   :  { %p261_p10 = pnand %p260_p9, %p254_p6 }
  0x5a   :  { %v172_v45 = vpop.eup %171 }
  0x5b   :  { %v89_v46 = vmul.f32 %v172_v45, %v88_v43 }
  0x5d   :  { %v94_v47 = vrot.slane %v89_v46, %v93_v44 }
  0x5f   :  { %v96_v49 = vmul.f32 %v94_v47, %v64_v19  ;;  %v97_v50 = vmul.f32 %v94_v47, %v65_v20  ;;  %v98_v51 = vmul.f32 %v94_v47, %v66_v21  ;;  %v99_v52 = vmul.f32 %v94_v47, %v67_v18 }
  0x61   :  { %v107_v53 = vadd.f32 %v163_v48, %v96_v49  ;;  %v108_v54 = vadd.f32 %v163_v48, %v97_v50  ;;  %v109_v55 = vadd.f32 %v163_v48, %v98_v51  ;;  %v110_v56 = vadd.f32 %v163_v48, %v99_v52 }
  0x63   :  { %111 = vst.msk [vmem:[#allocation7] sm:$0xff] %vm49_vm0, %v107_v53  ;;  %112 = vst.msk [vmem:[#allocation7 + $0x8] sm:$0xff] %vm49_vm0, %v108_v54 }
  0x64   :  { %113 = vst.msk [vmem:[#allocation7 + $0x10] sm:$0xff] %vm49_vm0, %v109_v55  ;;  %114 = vst.msk [vmem:[#allocation7 + $0x18] sm:$0xff] %vm49_vm0, %v110_v56 }
  0x65   :  { %264 = shalt.err (!%p261_p10)
}
  0x66   :  { %129 = dma.vmem_to_hbm [thread:$0]  %s124_s18, 512, %s359_s3, [#allocation4], %s283_s27, %s283_s27, %s284_s28  }
  0x67   :  { %277 = dma.done.wait [#allocation4], 512  }
  0x68   :  { %278 = vsyncadd [#allocation4], 4294966784 }
  0x69   :  { %279 = dma.done.wait [#allocation9], 32  }
  0x6a   :  { %280 = vsyncadd [#allocation9], 4294967264 }
  0x6b   :  { %159 = vsyncpa [#allocation3], 1 }
  0x6c   :  { %160 = vsyncpa [#allocation6], 1 }
  0x6d   :  { %161 = vsyncpa [#allocation4], 1 }
  0x6e   :  { %162 = vsyncpa [#allocation9], 1 }

</bundles_post_ra>
